<compile_context>
chip_gen: v7x
topology: tpu7x:2x2x1
jax: 0.10.0
libtpu: 0.0.40
codegen_flags: <defaults>
</compile_context>

<pallas_src>
import jax
import jax.numpy as jnp
from jax.experimental import pallas as pl
from jax.experimental.pallas import tpu as pltpu

PRIMITIVES = ["conv_3x3", "conv_1x1", "avg_pool_3x3", "skip_connect"]


def mixed_conv_kernel(w_ref, p_ref, o_ref):
    # w_ref: (Cout, 9*C)   folded mixed-op conv weight (constant across grid)
    # p_ref: (9*C, TN)     im2col^T tile, lane axis = spatial (B*H*W slice)
    # o_ref: (Cout, TN)    lane-dense output tile
    o_ref[...] = jnp.dot(
        w_ref[...], p_ref[...],
        preferred_element_type=jnp.float32).astype(o_ref.dtype)


def inner_cell(x_nchw, w3_oihw, w1_oihw, alphas, *, tile_n=256):
    """Pallas InnerCell forward.  x_nchw: (B, C, H, W) float32."""
    B, C, H, W = x_nchw.shape
    Cout = w3_oihw.shape[0]
    # skip_connect / avg_pool add the input directly -> channel counts must match.
    assert Cout == C, "InnerCell with skip/avg_pool requires inputChannel == outputChannel"

    a = jnp.asarray(alphas, jnp.float32)

    # ---- fold the 4 alpha-weighted ops into a single 3x3 conv weight --------
    eye = jnp.eye(Cout, C, dtype=jnp.float32)                       # (Cout, Cin)
    w_mixed = (1.0 + a[0]) * w3_oihw.astype(jnp.float32)            # conv_3x3
    w_mixed = w_mixed + (a[2] / 9.0) * eye[:, :, None, None]        # avg_pool_3x3
    center = a[1] * w1_oihw[:, :, 0, 0].astype(jnp.float32) + a[3] * eye
    w_mixed = w_mixed.at[:, :, 1, 1].add(center)                    # conv_1x1 + skip
    # (Cout, Cin, 3, 3) -> (Cout, 9*Cin), rows ordered (kh, kw, cin)
    w_t = jnp.transpose(w_mixed, (0, 2, 3, 1)).reshape(Cout, 9 * C)

    # ---- im2col^T in the wrapper: (9*C, B*H*W), lane axis = spatial ---------
    xpad = jnp.pad(x_nchw.astype(jnp.float32), ((0, 0), (0, 0), (1, 1), (1, 1)))
    taps = jnp.stack([xpad[:, :, kh:kh + H, kw:kw + W]
                      for kh in range(3) for kw in range(3)], axis=0)  # (9,B,C,H,W)
    patches_t = jnp.transpose(taps, (0, 2, 1, 3, 4)).reshape(9 * C, B * H * W)

    # ---- tile the spatial axis (multiple of 128 lanes; >=2 grid steps) ------
    M = B * H * W
    tn = min(tile_n, M)
    n_tiles = -(-M // tn)
    M_pad = n_tiles * tn
    if M_pad != M:
        patches_t = jnp.pad(patches_t, ((0, 0), (0, M_pad - M)))

    out_t = pl.pallas_call(
        mixed_conv_kernel,
        out_shape=jax.ShapeDtypeStruct((Cout, M_pad), jnp.float32),
        grid=(n_tiles,),
        in_specs=[
            pl.BlockSpec((Cout, 9 * C), lambda n: (0, 0)),   # weights, resident
            pl.BlockSpec((9 * C, tn), lambda n: (0, n)),     # im2col^T tile
        ],
        out_specs=pl.BlockSpec((Cout, tn), lambda n: (0, n)),
        compiler_params=pltpu.CompilerParams(
            dimension_semantics=("parallel",)),
    )(w_t, patches_t)

    # (Cout, B*H*W) -> (Cout, B, H, W) -> NCHW (pure layout work in the wrapper)
    out = out_t[:, :M].reshape(Cout, B, H, W)
    return jnp.transpose(out, (1, 0, 2, 3))


def ref_forward(x_nchw, w3_oihw, w1_oihw, alphas):
    """Pure-JAX reference (unfolded ops, XLA convs) for correctness check."""
    B, C, H, W = x_nchw.shape
    conv3 = jax.lax.conv_general_dilated(
        x_nchw, w3_oihw, (1, 1), ((1, 1), (1, 1)),
        dimension_numbers=("NCHW", "OIHW", "NCHW"))
    conv1 = jax.lax.conv_general_dilated(
        x_nchw, w1_oihw, (1, 1), ((0, 0), (0, 0)),
        dimension_numbers=("NCHW", "OIHW", "NCHW"))
    xpad = jnp.pad(x_nchw, ((0, 0), (0, 0), (1, 1), (1, 1)))
    avgp = sum(xpad[:, :, kh:kh + H, kw:kw + W]
               for kh in range(3) for kw in range(3)) / 9.0
    ops = [conv3, conv1, avgp, x_nchw]
    out = ops[0]
    for a_i, op in zip(alphas, ops):
        out = out + a_i * op
    return out


if __name__ == "__main__":
    key = jax.random.PRNGKey(0)
    B, C, H, W = 2, 8, 16, 16          # inputChannel == outputChannel, stride=1
    Cout = C

    kx, k3, k1, ka = jax.random.split(key, 4)
    x = jax.random.normal(kx, (B, C, H, W), jnp.float32)
    w3 = jax.random.normal(k3, (Cout, C, 3, 3), jnp.float32) * 0.1
    w1 = jax.random.normal(k1, (Cout, C, 1, 1), jnp.float32) * 0.1
    alphas = jax.nn.softmax(jax.random.normal(ka, (len(PRIMITIVES),),
                                              jnp.float32))

    out = inner_cell(x, w3, w1, alphas)
    out = jax.block_until_ready(out)

    ref = jax.block_until_ready(ref_forward(x, w3, w1, alphas))
    assert out.shape == (B, Cout, H, W)
    assert jnp.allclose(out, ref, atol=1e-4, rtol=1e-4), "mismatch vs reference"

    print("KERNEL_OK")
</pallas_src>

<mosaic_0001>
module attributes {stable_mosaic.version = 11 : i64} {
  func.func @mixed_conv_kernel(%arg0: i32, %arg1: memref<8x72xf32, #tpu.memory_space<vmem>>, %arg2: memref<72x256xf32, #tpu.memory_space<vmem>>, %arg3: memref<8x256xf32, #tpu.memory_space<vmem>>) attributes {dimension_semantics = [#tpu.dimension_semantics<parallel>], iteration_bounds = array<i64: 2>, scalar_prefetch = 0 : i64, scratch_operands = 0 : i64, tpu.core_type = #tpu.core_type<tc>, window_params = [{pipeline_mode = #tpu.pipeline_mode<synchronous>, transform_indices = @transform_0, window_bounds = array<i64: 8, 72>}, {transform_indices = @transform_1, window_bounds = array<i64: 72, 256>}, {transform_indices = @transform_2, window_bounds = array<i64: 8, 256>}]} {
    %c0 = arith.constant 0 : index
    %c0_0 = arith.constant 0 : index
    %0 = vector.load %arg1[%c0, %c0_0] : memref<8x72xf32, #tpu.memory_space<vmem>>, vector<8x72xf32>
    %c0_1 = arith.constant 0 : index
    %c0_2 = arith.constant 0 : index
    %1 = vector.load %arg2[%c0_1, %c0_2] : memref<72x256xf32, #tpu.memory_space<vmem>>, vector<72x256xf32>
    %cst = arith.constant dense<0.000000e+00> : vector<8x256xf32>
    %2 = tpu.matmul %0, %1, %cst {dimension_numbers = #tpu.dot_dimension_numbers<[1], [0], [0], [1], [0, 0, 1, 1], [], []>} : vector<8x72xf32>, vector<72x256xf32>, vector<8x256xf32> -> vector<8x256xf32>
    %c0_3 = arith.constant 0 : index
    %c0_4 = arith.constant 0 : index
    %3 = vector.load %arg3[%c0_3, %c0_4] : memref<8x256xf32, #tpu.memory_space<vmem>>, vector<8x256xf32>
    tpu.vector_store %arg3[%c0_3, %c0_4], %2 {strides = array<i32>} : memref<8x256xf32, #tpu.memory_space<vmem>>, vector<8x256xf32>,
    return
  }
  func.func @transform_0(%arg0: i32) -> (i32, i32) {
    %c0_i32 = arith.constant 0 : i32
    %c0_i32_0 = arith.constant 0 : i32
    %c0_i32_1 = arith.constant 0 : i32
    return %c0_i32, %c0_i32_0 : i32, i32
  }
  func.func @transform_1(%arg0: i32) -> (i32, i32) {
    %c0_i32 = arith.constant 0 : i32
    %c0_i32_0 = arith.constant 0 : i32
    return %c0_i32, %arg0 : i32, i32
  }
  func.func @transform_2(%arg0: i32) -> (i32, i32) {
    %c0_i32 = arith.constant 0 : i32
    %c0_i32_0 = arith.constant 0 : i32
    return %c0_i32, %arg0 : i32, i32
  }
}

</mosaic_0001>

<bundles_post_ra>
// kernel: tpu_custom_call.1
= control target key start
LH: loop header
LB: loop body
LE: loop exit
PB: predicated region body
PF: predicated region fallthrough
CT: control target
= control target key end

     0   :  { %7 = vsyncpa [#allocation3], 0  ;;  %s835_s0 = inlined_call_operand.hbm [shape: f32[8,72], index: 0, kind: input, shape index: {}]   ;;  %s836_s1 = inlined_call_operand.hbm [shape: f32[72,512], index: 1, kind: input, shape index: {}]   ;;  %s837_s2 = inlined_call_operand.hbm [shape: f32[8,512], index: 2, kind: output, shape index: {}]  }
   0x1   :  { %8 = vsyncpa [#allocation6], 0 }
   0x2   :  { %10 = vsyncpa [#allocation6 + $0x1], 0 }
   0x3   :  { %11 = vsyncpa [#allocation4], 0 }
   0x4   :  { %13 = vsyncpa [#allocation4 + $0x1], 0  ;;  %s618_s9 = smov 0   ;;  %s620_s10 = smov 0  }
   0x5   :  { %s622_s11 = smov 0   ;;  %s624_s12 = smov 0  }
   0x6 LB: > { %s639_s13 = sadd.s32 4294967295, %s594_s12   ;;  %s370_s14 = sadd.s32 4294967294, %s594_s12   ;;  %s594_s12 = sphi %s624_s12, %s862_s12   ;;  %s590_s11 = sphi %s622_s11, %s861_s11   ;;  %s586_s10 = sphi %s620_s10, %s860_s10   ;;  %s582_s9 = sphi %s618_s9, %s859_s9  }
   0x7   : > { %s643_s15 = sadd.s32 1, %s594_s12   ;;  %s47_s16 = sadd.s32 1, %s590_s11 }
   0x8   : > { %s44_s17 = ssub.s32 %s594_s12, %s643_s15  ;;  %p54_p0 = scmp.ne.s32.totalorder %s590_s11, %s586_s10 }
   0x9   : > { %p45_p1 = scmp.eq.s32.totalorder %s44_s17, 0  ;;  %p55_p2 = scmp.eq.s32.totalorder %s594_s12, 0 }
   0xa   : > { %p60_p3 = scmp.ne.s32.totalorder %s586_s10, %s582_s9  ;;  %p838_p4 = scmp.eq.s32.totalorder %s639_s13, 0 }
   0xb   : > { %s655_s18 = scalar_select %p45_p1, %s590_s11, %s47_s16  }
   0xc   : > { %p657_p5 = por %p55_p2, %p54_p0  ;;  %p663_p6 = por %p838_p4, %p60_p3 }
   0xd   : > { %p84_p7 = scmp.eq.s32.totalorder %s639_s13, 1  ;;  %p90_p8 = scmp.eq.s32.totalorder %s370_s14, 1 }
   0xe   : > { %s844_s20 = scalar_select %p663_p6, 1, 0 }
   0xf   : > { %p371_p9 = scmp.ge.s32.totalorder %s594_s12, 1  ;;  %p97_p10 = scmp.lt.s32.totalorder %s594_s12, 3 }
  0x10   : > { %p670_p11 = por %p84_p7, %p54_p0  ;;  %p674_p12 = por %p90_p8, %p60_p3 }
  0x11   : > { %p678_p13 = pnand %p371_p9, %p97_p10  ;;  %s596_s24 = smov [#allocation2]  }
  0x12   : > { %s845_s21 = scalar_select %p670_p11, 1, 0 }
  0x13   : > { %s846_s22 = scalar_select %p674_p12, 1, 0 }
  0x14   : > { %s847_s23 = scalar_select %p678_p13, 1, 0 }
  0x15   : > { %p413_p2 = pneg %p678_p13  ;;  %s110_s25 = sshll.u32 %s596_s24, 4  ;;  %s111_s25 = int_to_ptr.vmem [resolvable:$true] %s110_s25 }
  0x16   : > { %p426_p4 = scmp.lt.s32.totalorder %s594_s12, 2  ;;  %p848_p0 = scmp.eq.s32.totalorder %s639_s13, 0 }
  0x17   : > { %s121_s27 = sand.u32 1, %s590_s11   ;;  %s466_s4 = scalar_lea.hbm %s835_s0, 128 }
  0x18   : > { %p688_p7 = pnand %p413_p2, %p848_p0  ;;  %p695_p3 = pnand %p426_p4, %p657_p5 }
  0x19   : > { %s403_s29 = smul.u32 144, %s121_s27  ;;  %p467_p8 = scmp.ne.s32.totalorder %s835_s0, %s466_s4 }
  0x1a   : > { %s850_s28 = scalar_select %p695_p3, 1, 0 }
  0x1b   : > { %p468_p9 = pneg %p688_p7  ;;  %p473_p4 = scmp.lt.u32.totalorder %s466_s4, %s835_s0 }
  0x1d   : > { %p469_p10 = pnand %p468_p9, %p467_p8 }
  0x1f   : > { %p470_p2 = pneg %p469_p10 }
  0x21   : > { %p475_p5 = pnand %p473_p4, %p470_p2 }
  0x23   : > { %478 = shalt.err (!%p475_p5)
}
  0x24   : > { %s479_s14 = scalar_lea.vmem %s111_s25, 128  ;;  %p487_p11 = scmp.lt.s32.totalorder %s111_s25, %s111_s25 }
  0x25   : > { %p480_p0 = scmp.ne.s32.totalorder %s111_s25, %s479_s14  ;;  %p488_p6 = scmp.lt.s32.totalorder %s479_s14, %s479_s14 }
  0x27   : > { %p482_p1 = pnand %p480_p0, %p468_p9  ;;  %p489_p13 = por %p488_p6, %p487_p11 }
  0x29   : > { %p483_p12 = pneg %p482_p1 }
  0x2b   : > { %p490_p3 = pnand %p489_p13, %p483_p12 }
  0x2d   : > { %493 = shalt.err (!%p490_p3)
}
  0x2e   : > { %416 = dma.hbm_to_vmem [thread:$0]  (!%p688_p7), %s835_s0, 128, %s111_s25, [#allocation3]  }
  0x2f   : > { %s385_s19 = sshll.u32 %s594_s12, 8  ;;  %s125_s24 = scalar_lea.vmem [#allocation5], %s403_s29 }
  0x30   : > { %s132_s30 = sshll.u32 %s125_s24, 4  ;;  %s719_s5 = scalar_lea.hbm %s836_s1, %s385_s19  ;;  %s721_s30 = int_to_ptr.vmem [resolvable:$true] %s132_s30 }
  0x31   : > { %s723_s26 = scalar_lea.sflag [#allocation6], %s121_s27  ;;  %s494_s6 = scalar_lea.hbm %s719_s5, 2304 }
  0x32   : > { %p495_p6 = scmp.ne.s32.totalorder %s719_s5, %s494_s6  ;;  %p851_p11 = scmp.ne.s32.totalorder %s850_s28, 0 }
  0x33   : > { %s499_s7 = scalar_lea.hbm %s836_s1, 4608  ;;  %p500_p7 = scmp.lt.u32.totalorder %s719_s5, %s836_s1 }
  0x34   : > { %p496_p12 = pneg %p851_p11  ;;  %p501_p3 = scmp.lt.u32.totalorder %s499_s7, %s494_s6 }
  0x35   : > { %p503_p9 = scmp.lt.u32.totalorder %s494_s6, %s719_s5 }
  0x36   : > { %p497_p13 = pnand %p496_p12, %p495_p6  ;;  %p502_p8 = por %p501_p3, %p500_p7 }
  0x38   : > { %p498_p1 = pneg %p497_p13  ;;  %p504_p10 = por %p503_p9, %p502_p8 }
  0x3a   : > { %p505_p2 = pnand %p504_p10, %p498_p1 }
  0x3c   : > { %508 = shalt.err (!%p505_p2)
}
  0x3d   : > { %s509_s27 = scalar_lea.vmem %s721_s30, 2304  ;;  %s597_s16 = smov [#allocation5]  }
  0x3e   : > { %p510_p4 = scmp.ne.s32.totalorder %s721_s30, %s509_s27  ;;  %s514_s17 = sshll.u32 %s597_s16, 4  ;;  %s515_s17 = int_to_ptr.vmem [resolvable:$false] %s514_s17 }
  0x3f   : > { %s516_s19 = scalar_lea.vmem %s515_s17, 4608  ;;  %p517_p6 = scmp.lt.s32.totalorder %s721_s30, %s515_s17 }
  0x40   : > { %p512_p5 = pnand %p510_p4, %p496_p12  ;;  %p518_p13 = scmp.lt.s32.totalorder %s516_s19, %s509_s27 }
  0x42   : > { %p513_p0 = pneg %p512_p5  ;;  %p519_p7 = por %p518_p13, %p517_p6 }
  0x44   : > { %p520_p3 = pnand %p519_p7, %p513_p0 }
  0x46   : > { %523 = shalt.err (!%p520_p3)
}
  0x47   : > { %s598_s24 = smov 512   ;;  %s599_s3 = smov 256  }
  0x48   : > { %s600_s4 = smov 16   ;;  %p852_p12 = scmp.ne.s32.totalorder %s847_s23, 0 }
  0x49   : > { %420 = dma.hbm_to_vmem [thread:$0]  (!%p851_p11), %s719_s5, 2304, %s721_s30, %s723_s26, %s598_s24, %s599_s3, %s600_s4  }
  0x4a   : > { %144 = sbr.rel (%p852_p12) target bundleno = 335 (0x14f), region = 28  ;;  %p853_p1 = scmp.eq.s32.totalorder (!%p852_p12), %s639_s13, 0 }
  0x51   : > { %569 = dma.done.wait (%p853_p1), [#allocation3], 128   ;;  %p854_p8 = pmov %p853_p1 }
  0x52   : > { %s758_s6 = sand.u32 1, %s586_s10   ;;  %p855_p11 = scmp.ne.s32.totalorder %s844_s20, 0 }
  0x53   : > { %571 = vsyncadd (%p854_p8), [#allocation3], 4294967168  ;;  %s404_s25 = smul.u32 144, %s758_s6  ;;  %s151_s29 = scalar_lea.sflag [#allocation6], %s758_s6 }
  0x55   : > { %s762_s7 = scalar_lea.vmem [#allocation5], %s404_s25 }
  0x56   : > { %573 = dma.done.wait (%p855_p11), %s151_s29, 2304  }
  0x57   : > { %575 = vsyncadd (%p855_p11), %s151_s29, 4294964992  ;;  %v601_v0 = vmov 0.0   ;;  %v179_v1 = vld [vmem:[%s762_s7 + $0x8] sm:$0xff]  ;;  %v181_v2 = vld [vmem:[%s762_s7 + $0x18] sm:$0xff]  ;;  %vm196_vm0 = vcmask 588800   ;;  %s378_s20 = sshll.u32 %s758_s6, 4 }
  0x58   : > { %264 = vmatprep.mubr.f32.mxu0 %v601_v0  ;;  %v178_v3 = vld [vmem:[%s762_s7] sm:$0xff]  ;;  %v387_v4 = vpack.c.bf16 %v181_v2, %v179_v1  ;;  %v180_v5 = vld [vmem:[%s762_s7 + $0x10] sm:$0xff]  ;;  %v183_v6 = vld [vmem:[%s762_s7 + $0x28] sm:$0xff]  ;;  %s174_s23 = scalar_lea.vmem [#allocation7], %s378_s20  ;;  %s386_s30 = sshll.u32 %s639_s13, 8 }
  0x59   : > { %v185_v7 = vld [vmem:[%s762_s7 + $0x38] sm:$0xff]  ;;  %v389_v8 = vpack.c.bf16 %v180_v5, %v178_v3  ;;  %v182_v10 = vld [vmem:[%s762_s7 + $0x20] sm:$0xff]  ;;  %v184_v11 = vld [vmem:[%s762_s7 + $0x30] sm:$0xff]  ;;  %s288_s28 = sshll.u32 %s174_s23, 4  ;;  %s793_s8 = scalar_lea.hbm %s837_s2, %s386_s30  ;;  %s788_s28 = int_to_ptr.vmem [resolvable:$true] %s288_s28 }
  0x5a   : > { %v391_v9 = vpack.c.bf16 %v185_v7, %v183_v6  ;;  %v187_v12 = vld [vmem:[%s762_s7 + $0x48] sm:$0xff]  ;;  %388 = vmatprep.subr.bf16.mxu0 %v387_v4  ;;  %v189_v13 = vld [vmem:[%s762_s7 + $0x58] sm:$0xff]  ;;  %v393_v14 = vpack.c.bf16 %v184_v11, %v182_v10  ;;  %v186_v16 = vld [vmem:[%s762_s7 + $0x40] sm:$0xff]  ;;  %s274_s14 = scalar_lea.sflag [#allocation4], %s758_s6  ;;  %s524_s27 = scalar_lea.vmem %s788_s28, 256 }
  0x5b   : > { %390 = vmatpush1.bf16.msra.mxu0 %v389_v8  ;;  %v395_v15 = vpack.c.bf16 %v189_v13, %v187_v12  ;;  %v188_v17 = vld [vmem:[%s762_s7 + $0x50] sm:$0xff]  ;;  %v191_v18 = vld [vmem:[%s762_s7 + $0x68] sm:$0xff]  ;;  %v193_v19 = vld [vmem:[%s762_s7 + $0x78] sm:$0xff]  ;;  %p525_p9 = scmp.ne.s32.totalorder %s788_s28, %s524_s27  ;;  %p856_p10 = scmp.ne.s32.totalorder %s845_s21, 0 }
  0x5c   : > { %392 = vmatprep.subr.bf16.mxu0 %v391_v9  ;;  %v397_v20 = vpack.c.bf16 %v188_v17, %v186_v16  ;;  %v399_v21 = vpack.c.bf16 %v193_v19, %v191_v18  ;;  %v190_v22 = vld [vmem:[%s762_s7 + $0x60] sm:$0xff]  ;;  %v192_v23 = vld [vmem:[%s762_s7 + $0x70] sm:$0xff]  ;;  %v195_v25 = vld [vmem:[%s762_s7 + $0x88] sm:$0xff]  ;;  %s602_s13 = smov [#allocation7]  }
  0x5d   : > { %v401_v24 = vpack.c.bf16 %v192_v23, %v190_v22  ;;  %v194_v26 = vld [vmem:[%s762_s7 + $0x80] sm:$0xff]  ;;  %v177_v27 = vld [vmem:[#allocation2] sm:$0xff]  ;;  %p526_p2 = pnand %p525_p9, %p856_p10  ;;  %s528_s16 = sshll.u32 %s602_s13, 4  ;;  %s529_s16 = int_to_ptr.vmem [resolvable:$false] %s528_s16 }
  0x5e   : > { %s530_s17 = scalar_lea.vmem %s529_s16, 512  ;;  %p531_p5 = scmp.lt.s32.totalorder %s788_s28, %s529_s16 }
  0x5f   : > { %394 = vmatpush1.bf16.msra.mxu0 %v393_v14  ;;  %p527_p4 = pneg %p526_p2  ;;  %p532_p0 = scmp.lt.s32.totalorder %s530_s17, %s524_s27 }
  0x60   : > { %396 = vmatprep.subr.bf16.mxu0 %v395_v15 }
  0x61   : > { %p533_p6 = por %p532_p0, %p531_p5 }
  0x63   : > { %398 = vmatpush1.bf16.msra.mxu0 %v397_v20  ;;  %p534_p13 = pnand %p533_p6, %p527_p4 }
  0x64   : > { %400 = vmatprep.subr.bf16.mxu0 %v399_v21 }
  0x67   : > { %402 = vmatpush1.bf16.msra.mxu0 %v401_v24 }
  0x68   : > { %216 = vmatprep.subr.mxu0 %v195_v25 }
  0x6b   : > { %217 = vmatpush1.msra.mxu0 %v194_v26 }
  0x6c   : > { %379 = vmatmul.mubr.msk.f32.vlgmr.msra.gmra.mrb[0].mxu0 %vm196_vm0, %v177_v27 }
 0x13f   : > { %v266_v28 = vpop.f32.mrb[0].mxu0 }
 0x140   : > { %271 = vst [vmem:[%s174_s23] sm:$0xff] %v266_v28  ;;  %v268_v29 = vpop.f32.mrb[1].mxu0 }
 0x141   : > { %272 = vst [vmem:[%s174_s23 + $0x8] sm:$0xff] %v268_v29 }
 0x142   : > { %537 = shalt.err (!%p534_p13)
}
 0x143   : > { %s538_s19 = scalar_lea.hbm %s793_s8, 256  ;;  %s542_s4 = scalar_lea.hbm %s837_s2, 512 }
 0x144   : > { %p539_p7 = scmp.ne.s32.totalorder %s793_s8, %s538_s19  ;;  %p543_p1 = scmp.lt.u32.totalorder %s793_s8, %s837_s2 }
 0x145   : > { %p544_p8 = scmp.lt.u32.totalorder %s542_s4, %s538_s19  ;;  %p546_p9 = scmp.lt.u32.totalorder %s538_s19, %s793_s8 }
 0x146   : > { %p540_p3 = pnand %p539_p7, %p856_p10 }
 0x147   : > { %p545_p11 = por %p544_p8, %p543_p1 }
 0x148   : > { %p541_p12 = pneg %p540_p3 }
 0x149   : > { %p547_p2 = por %p546_p9, %p545_p11 }
 0x14b   : > { %p548_p4 = pnand %p547_p2, %p541_p12 }
 0x14d   : > { %551 = shalt.err (!%p548_p4)
}
 0x14e   : > { %411 = dma.vmem_to_hbm [thread:$0]  (%p856_p10), %s788_s28, 256, %s793_s8, %s274_s14  }
 0x14f PF: > { %s300_s29 = sand.u32 1, %s582_s9   ;;  %p857_p5 = scmp.ne.s32.totalorder %s846_s22, 0 }
 0x150   : > { %p858_p0 = scmp.ge.s32.totalorder %s594_s12, 2  ;;  %s301_s7 = scalar_lea.sflag [#allocation4], %s300_s29 }
 0x152   : > { %p422_p6 = pnand %p858_p0, %p857_p5 }
 0x154   : > { %577 = dma.done.wait (!%p422_p6), %s301_s7, 256  }
 0x155   : > { %579 = vsyncadd (!%p422_p6), %s301_s7, 4294967040  ;;  %p16_p13 = scmp.ge.s32.totalorder %s643_s15, 4   ;;  %s859_s9 = smov %s586_s10 }
 0x156   : > { %s860_s10 = smov %s590_s11  ;;  %s861_s11 = smov %s655_s18 }
 0x157   : > { %s862_s12 = smov %s643_s15  ;;  %18 = sbr.rel (!%p16_p13) target bundleno = 6 (0x6), region = 78 }
 0x15e   :  { %306 = vsyncpa [#allocation3], 1 }
 0x15f   :  { %308 = vsyncpa [#allocation3 + $0x1], 1 }
 0x160   :  { %309 = vsyncpa [#allocation6], 1 }
 0x161   :  { %311 = vsyncpa [#allocation6 + $0x1], 1 }
 0x162   :  { %312 = vsyncpa [#allocation4], 1 }
 0x163   :  { %314 = vsyncpa [#allocation4 + $0x1], 1 }

</bundles_post_ra>
